<compile_context>
chip_gen: v7x
topology: tpu7x:2x2x1
jax: 0.10.0
libtpu: 0.0.40
codegen_flags: <defaults>
</compile_context>

<pallas_src>
import jax
import jax.numpy as jnp
from jax.experimental import pallas as pl
from jax.experimental.pallas import tpu as pltpu

DROP_CHANNELS = 9  # matches x[:, :, 9:] in the PyTorch forward


def nlinear_kernel(x_ref, w_ref, b_ref, o_ref):
    # x_ref: [TB, S, C], w_ref: [S, C], b_ref: [1, C], o_ref: [TB, C - 9]
    S = x_ref.shape[1]
    w = w_ref[...].astype(jnp.float32)
    # Unrolled multiply-accumulate over the (small, static) S axis: stays on
    # the VALU slots instead of an XLU cross-sublane reduce.
    acc = x_ref[:, 0, :].astype(jnp.float32) * w[0, :]
    for s in range(1, S):
        acc = acc + x_ref[:, s, :].astype(jnp.float32) * w[s, :]
    y = acc + b_ref[...].astype(jnp.float32)       # [TB, C] (+ [1, C] broadcast)
    # Channel drop fused into the store.
    o_ref[...] = y[:, DROP_CHANNELS:].astype(o_ref.dtype)


def _fold_seq_last_into_weights(w_sc):
    """Forward-only algebraic identity:
       sum_s (x[s] - x[S-1]) * w[s] + x[S-1]
         = sum_s x[s] * w[s] + x[S-1] * (1 - sum_s w[s]).
    """
    S = w_sc.shape[0]
    return w_sc.at[S - 1, :].add(1.0 - jnp.sum(w_sc, axis=0))


def _round_up(v, m):
    return (v + m - 1) // m * m


def _pick_batch_tile(B, S, C, itemsize, vmem_budget_bytes=8 * 1024 * 1024):
    """Biggest batch tile whose *padded* double-buffered blocks fit a
    conservative VMEM budget (safe for v7x's smaller scoped VMEM)."""
    # Per batch row, the [S, C] slab pads to [round8(S), round128(C)] in VMEM;
    # the output row pads to [*, round128(C-9)].
    in_row = itemsize * _round_up(S, 8) * _round_up(C, 128)
    out_row = itemsize * _round_up(C - DROP_CHANNELS, 128)
    per_row = in_row + out_row
    tb = vmem_budget_bytes // (2 * per_row)        # double-buffered pipeline
    tb = max(8, min(int(tb), 512))
    if tb >= B:
        return B                                   # single block covers the batch
    return (tb // 8) * 8                           # keep sublane-aligned block rows


def nlinear_forward(x, w_sc, bias_c):
    """x: [B, S, C]; w_sc: [S, C] with w_sc[s, c] == Linear[c].weight[0, s];
    bias_c: [1, C]  ->  [B, C - 9]."""
    B, S, C = x.shape
    w_fold = _fold_seq_last_into_weights(w_sc.astype(jnp.float32))
    tb = _pick_batch_tile(B, S, C, x.dtype.itemsize)
    grid = (pl.cdiv(B, tb),)
    return pl.pallas_call(
        nlinear_kernel,
        out_shape=jax.ShapeDtypeStruct((B, C - DROP_CHANNELS), x.dtype),
        grid=grid,
        in_specs=[
            pl.BlockSpec((tb, S, C), lambda i: (i, 0, 0)),
            pl.BlockSpec((S, C), lambda i: (0, 0)),
            pl.BlockSpec((1, C), lambda i: (0, 0)),
        ],
        out_specs=pl.BlockSpec((tb, C - DROP_CHANNELS), lambda i: (i, 0)),
        compiler_params=pltpu.CompilerParams(
            dimension_semantics=("parallel",)),
    )(x, w_fold, bias_c)


def nlinear_reference(x, w_sc, bias_c):
    # Direct transcription of the PyTorch forward (no weight fold).
    seq_last = x[:, -1:, :]
    xd = x - seq_last
    y = jnp.einsum("bsc,sc->bc", xd, w_sc) + bias_c + seq_last[:, 0, :]
    return y[:, DROP_CHANNELS:]


if __name__ == "__main__":
    # Small shapes implied by the module: pred_len (out_len) must be 1,
    # channels (NUM_ALL_FEATURES) > 9.
    B, S, C = 2, 8, 16  # batch, seq_len (in_len), channels

    key = jax.random.PRNGKey(0)
    kx, kw, kb = jax.random.split(key, 3)

    x = jax.random.normal(kx, (B, S, C), dtype=jnp.float32)
    # Per-channel Linear params (torch-style uniform(-1/sqrt(S), 1/sqrt(S)))
    bound = 1.0 / jnp.sqrt(jnp.float32(S))
    w_sc = jax.random.uniform(kw, (S, C), dtype=jnp.float32, minval=-bound, maxval=bound)
    bias_c = jax.random.uniform(kb, (1, C), dtype=jnp.float32, minval=-bound, maxval=bound)

    out = jax.block_until_ready(nlinear_forward(x, w_sc, bias_c))
    ref = nlinear_reference(x, w_sc, bias_c)

    assert out.shape == (B, C - DROP_CHANNELS), out.shape
    assert jnp.allclose(out, ref, atol=1e-5, rtol=1e-5), "mismatch vs reference"

    print("KERNEL_OK")
</pallas_src>

<mosaic_0001>
module attributes {stable_mosaic.version = 11 : i64} {
  func.func @nlinear_kernel(%arg0: i32, %arg1: memref<2x8x16xf32, #tpu.memory_space<vmem>>, %arg2: memref<8x16xf32, #tpu.memory_space<vmem>>, %arg3: memref<1x16xf32, #tpu.memory_space<vmem>>, %arg4: memref<2x7xf32, #tpu.memory_space<vmem>>) attributes {dimension_semantics = [#tpu.dimension_semantics<parallel>], iteration_bounds = array<i64: 1>, scalar_prefetch = 0 : i64, scratch_operands = 0 : i64, tpu.core_type = #tpu.core_type<tc>, window_params = [{transform_indices = @transform_0, window_bounds = array<i64: 2, 8, 16>}, {pipeline_mode = #tpu.pipeline_mode<synchronous>, transform_indices = @transform_1, window_bounds = array<i64: 8, 16>}, {pipeline_mode = #tpu.pipeline_mode<synchronous>, transform_indices = @transform_2, window_bounds = array<i64: 1, 16>}, {transform_indices = @transform_3, window_bounds = array<i64: 2, 7>}]} {
    %c0 = arith.constant 0 : index
    %c0_0 = arith.constant 0 : index
    %0 = vector.load %arg2[%c0, %c0_0] : memref<8x16xf32, #tpu.memory_space<vmem>>, vector<8x16xf32>
    %c0_1 = arith.constant 0 : index
    %c0_2 = arith.constant 0 : index
    %c0_3 = arith.constant 0 : index
    %1 = vector.load %arg1[%c0_1, %c0_2, %c0_3] : memref<2x8x16xf32, #tpu.memory_space<vmem>>, vector<2x1x16xf32>
    %2 = vector.shape_cast %1 : vector<2x1x16xf32> to vector<2x16xf32>
    %3 = vector.extract_strided_slice %0 {offsets = [0, 0], sizes = [1, 16], strides = [1, 1]} : vector<8x16xf32> to vector<1x16xf32>
    %4 = vector.shape_cast %3 : vector<1x16xf32> to vector<16xf32>
    %5 = vector.shape_cast %4 : vector<16xf32> to vector<1x16xf32>
    %6 = vector.broadcast %5 : vector<1x16xf32> to vector<2x16xf32>
    %7 = arith.mulf %2, %6 : vector<2x16xf32>
    %c0_4 = arith.constant 0 : index
    %c1 = arith.constant 1 : index
    %c0_5 = arith.constant 0 : index
    %8 = vector.load %arg1[%c0_4, %c1, %c0_5] : memref<2x8x16xf32, #tpu.memory_space<vmem>>, vector<2x1x16xf32>
    %9 = vector.shape_cast %8 : vector<2x1x16xf32> to vector<2x16xf32>
    %10 = vector.extract_strided_slice %0 {offsets = [1, 0], sizes = [1, 16], strides = [1, 1]} : vector<8x16xf32> to vector<1x16xf32>
    %11 = vector.shape_cast %10 : vector<1x16xf32> to vector<16xf32>
    %12 = vector.shape_cast %11 : vector<16xf32> to vector<1x16xf32>
    %13 = vector.broadcast %12 : vector<1x16xf32> to vector<2x16xf32>
    %14 = arith.mulf %9, %13 : vector<2x16xf32>
    %15 = arith.addf %7, %14 : vector<2x16xf32>
    %c0_6 = arith.constant 0 : index
    %c2 = arith.constant 2 : index
    %c0_7 = arith.constant 0 : index
    %16 = vector.load %arg1[%c0_6, %c2, %c0_7] : memref<2x8x16xf32, #tpu.memory_space<vmem>>, vector<2x1x16xf32>
    %17 = vector.shape_cast %16 : vector<2x1x16xf32> to vector<2x16xf32>
    %18 = vector.extract_strided_slice %0 {offsets = [2, 0], sizes = [1, 16], strides = [1, 1]} : vector<8x16xf32> to vector<1x16xf32>
    %19 = vector.shape_cast %18 : vector<1x16xf32> to vector<16xf32>
    %20 = vector.shape_cast %19 : vector<16xf32> to vector<1x16xf32>
    %21 = vector.broadcast %20 : vector<1x16xf32> to vector<2x16xf32>
    %22 = arith.mulf %17, %21 : vector<2x16xf32>
    %23 = arith.addf %15, %22 : vector<2x16xf32>
    %c0_8 = arith.constant 0 : index
    %c3 = arith.constant 3 : index
    %c0_9 = arith.constant 0 : index
    %24 = vector.load %arg1[%c0_8, %c3, %c0_9] : memref<2x8x16xf32, #tpu.memory_space<vmem>>, vector<2x1x16xf32>
    %25 = vector.shape_cast %24 : vector<2x1x16xf32> to vector<2x16xf32>
    %26 = vector.extract_strided_slice %0 {offsets = [3, 0], sizes = [1, 16], strides = [1, 1]} : vector<8x16xf32> to vector<1x16xf32>
    %27 = vector.shape_cast %26 : vector<1x16xf32> to vector<16xf32>
    %28 = vector.shape_cast %27 : vector<16xf32> to vector<1x16xf32>
    %29 = vector.broadcast %28 : vector<1x16xf32> to vector<2x16xf32>
    %30 = arith.mulf %25, %29 : vector<2x16xf32>
    %31 = arith.addf %23, %30 : vector<2x16xf32>
    %c0_10 = arith.constant 0 : index
    %c4 = arith.constant 4 : index
    %c0_11 = arith.constant 0 : index
    %32 = vector.load %arg1[%c0_10, %c4, %c0_11] : memref<2x8x16xf32, #tpu.memory_space<vmem>>, vector<2x1x16xf32>
    %33 = vector.shape_cast %32 : vector<2x1x16xf32> to vector<2x16xf32>
    %34 = vector.extract_strided_slice %0 {offsets = [4, 0], sizes = [1, 16], strides = [1, 1]} : vector<8x16xf32> to vector<1x16xf32>
    %35 = vector.shape_cast %34 : vector<1x16xf32> to vector<16xf32>
    %36 = vector.shape_cast %35 : vector<16xf32> to vector<1x16xf32>
    %37 = vector.broadcast %36 : vector<1x16xf32> to vector<2x16xf32>
    %38 = arith.mulf %33, %37 : vector<2x16xf32>
    %39 = arith.addf %31, %38 : vector<2x16xf32>
    %c0_12 = arith.constant 0 : index
    %c5 = arith.constant 5 : index
    %c0_13 = arith.constant 0 : index
    %40 = vector.load %arg1[%c0_12, %c5, %c0_13] : memref<2x8x16xf32, #tpu.memory_space<vmem>>, vector<2x1x16xf32>
    %41 = vector.shape_cast %40 : vector<2x1x16xf32> to vector<2x16xf32>
    %42 = vector.extract_strided_slice %0 {offsets = [5, 0], sizes = [1, 16], strides = [1, 1]} : vector<8x16xf32> to vector<1x16xf32>
    %43 = vector.shape_cast %42 : vector<1x16xf32> to vector<16xf32>
    %44 = vector.shape_cast %43 : vector<16xf32> to vector<1x16xf32>
    %45 = vector.broadcast %44 : vector<1x16xf32> to vector<2x16xf32>
    %46 = arith.mulf %41, %45 : vector<2x16xf32>
    %47 = arith.addf %39, %46 : vector<2x16xf32>
    %c0_14 = arith.constant 0 : index
    %c6 = arith.constant 6 : index
    %c0_15 = arith.constant 0 : index
    %48 = vector.load %arg1[%c0_14, %c6, %c0_15] : memref<2x8x16xf32, #tpu.memory_space<vmem>>, vector<2x1x16xf32>
    %49 = vector.shape_cast %48 : vector<2x1x16xf32> to vector<2x16xf32>
    %50 = vector.extract_strided_slice %0 {offsets = [6, 0], sizes = [1, 16], strides = [1, 1]} : vector<8x16xf32> to vector<1x16xf32>
    %51 = vector.shape_cast %50 : vector<1x16xf32> to vector<16xf32>
    %52 = vector.shape_cast %51 : vector<16xf32> to vector<1x16xf32>
    %53 = vector.broadcast %52 : vector<1x16xf32> to vector<2x16xf32>
    %54 = arith.mulf %49, %53 : vector<2x16xf32>
    %55 = arith.addf %47, %54 : vector<2x16xf32>
    %c0_16 = arith.constant 0 : index
    %c7 = arith.constant 7 : index
    %c0_17 = arith.constant 0 : index
    %56 = vector.load %arg1[%c0_16, %c7, %c0_17] : memref<2x8x16xf32, #tpu.memory_space<vmem>>, vector<2x1x16xf32>
    %57 = vector.shape_cast %56 : vector<2x1x16xf32> to vector<2x16xf32>
    %58 = vector.extract_strided_slice %0 {offsets = [7, 0], sizes = [1, 16], strides = [1, 1]} : vector<8x16xf32> to vector<1x16xf32>
    %59 = vector.shape_cast %58 : vector<1x16xf32> to vector<16xf32>
    %60 = vector.shape_cast %59 : vector<16xf32> to vector<1x16xf32>
    %61 = vector.broadcast %60 : vector<1x16xf32> to vector<2x16xf32>
    %62 = arith.mulf %57, %61 : vector<2x16xf32>
    %63 = arith.addf %55, %62 : vector<2x16xf32>
    %c0_18 = arith.constant 0 : index
    %c0_19 = arith.constant 0 : index
    %64 = vector.load %arg3[%c0_18, %c0_19] : memref<1x16xf32, #tpu.memory_space<vmem>>, vector<1x16xf32>
    %65 = vector.broadcast %64 : vector<1x16xf32> to vector<2x16xf32>
    %66 = arith.addf %63, %65 : vector<2x16xf32>
    %67 = vector.extract_strided_slice %66 {offsets = [0, 9], sizes = [2, 7], strides = [1, 1]} : vector<2x16xf32> to vector<2x7xf32>
    %c0_20 = arith.constant 0 : index
    %c0_21 = arith.constant 0 : index
    %68 = vector.load %arg4[%c0_20, %c0_21] : memref<2x7xf32, #tpu.memory_space<vmem>>, vector<2x7xf32>
    tpu.vector_store %arg4[%c0_20, %c0_21], %67 {strides = array<i32>} : memref<2x7xf32, #tpu.memory_space<vmem>>, vector<2x7xf32>,
    return
  }
  func.func @transform_0(%arg0: i32) -> (i32, i32, i32) {
    %c0_i32 = arith.constant 0 : i32
    %c0_i32_0 = arith.constant 0 : i32
    %c0_i32_1 = arith.constant 0 : i32
    return %arg0, %c0_i32, %c0_i32_0 : i32, i32, i32
  }
  func.func @transform_1(%arg0: i32) -> (i32, i32) {
    %c0_i32 = arith.constant 0 : i32
    %c0_i32_0 = arith.constant 0 : i32
    %c0_i32_1 = arith.constant 0 : i32
    return %c0_i32, %c0_i32_0 : i32, i32
  }
  func.func @transform_2(%arg0: i32) -> (i32, i32) {
    %c0_i32 = arith.constant 0 : i32
    %c0_i32_0 = arith.constant 0 : i32
    %c0_i32_1 = arith.constant 0 : i32
    return %c0_i32, %c0_i32_0 : i32, i32
  }
  func.func @transform_3(%arg0: i32) -> (i32, i32) {
    %c0_i32 = arith.constant 0 : i32
    %c0_i32_0 = arith.constant 0 : i32
    return %arg0, %c0_i32 : i32, i32
  }
}

</mosaic_0001>

<bundles_post_ra>
// kernel: tpu_custom_call.1
= control target key start
LH: loop header
LB: loop body
LE: loop exit
PB: predicated region body
PF: predicated region fallthrough
CT: control target
= control target key end

     0   :  { %8 = vsyncpa [#allocation3], 0  ;;  %s299_s0 = inlined_call_operand.hbm [shape: f32[2,8,16], index: 0, kind: input, shape index: {}]   ;;  %s300_s1 = inlined_call_operand.hbm [shape: f32[8,16], index: 1, kind: input, shape index: {}]   ;;  %s301_s2 = inlined_call_operand.vmem [shape: f32[1,16], index: 2, kind: input, shape index: {}]   ;;  %s302_s3 = inlined_call_operand.hbm [shape: f32[2,7], index: 3, kind: output, shape index: {}]  }
   0x1   :  { %9 = vsyncpa [#allocation6], 0 }
   0x2   :  { %10 = vsyncpa [#allocation4], 0  ;;  %s234_s12 = smov [#allocation2]   ;;  %s162_s16 = scalar_lea.hbm %s299_s0, 256 }
   0x3   :  { %s16_s13 = sshll.u32 %s234_s12, 4  ;;  %p163_p0 = scmp.ne.s32.totalorder %s299_s0, %s162_s16  ;;  %s17_s13 = int_to_ptr.vmem [resolvable:$true] %s16_s13 }
   0x4   :  { %p166_p1 = scmp.lt.u32.totalorder %s162_s16, %s299_s0 }
   0x6   :  { %p168_p2 = pnand %p166_p1, %p163_p0 }
   0x8   :  { %171 = shalt.err (!%p168_p2)
}
   0x9   :  { %s172_s21 = scalar_lea.vmem %s17_s13, 256  ;;  %p177_p4 = scmp.lt.s32.totalorder %s17_s13, %s17_s13 }
   0xa   :  { %p173_p3 = scmp.ne.s32.totalorder %s17_s13, %s172_s21  ;;  %p178_p5 = scmp.lt.s32.totalorder %s172_s21, %s172_s21 }
   0xc   :  { %p179_p6 = por %p178_p5, %p177_p4 }
   0xe   :  { %p180_p7 = pnand %p179_p6, %p173_p3 }
  0x10   :  { %183 = shalt.err (!%p180_p7)
}
  0x11   :  { %s235_s22 = smov 128   ;;  %s236_s23 = smov 8  }
  0x12   :  { %22 = dma.hbm_to_vmem [thread:$0]  %s299_s0, 256, %s17_s13, [#allocation3], %s235_s22, %s235_s22, %s236_s23  }
  0x13   :  { %s237_s26 = smov [#allocation5]   ;;  %s184_s30 = scalar_lea.hbm %s300_s1, 128 }
  0x14   :  { %s29_s27 = sshll.u32 %s237_s26, 4  ;;  %p185_p8 = scmp.ne.s32.totalorder %s300_s1, %s184_s30  ;;  %s30_s27 = int_to_ptr.vmem [resolvable:$true] %s29_s27 }
  0x15   :  { %p188_p9 = scmp.lt.u32.totalorder %s184_s30, %s300_s1 }
  0x17   :  { %p190_p10 = pnand %p188_p9, %p185_p8 }
  0x19   :  { %193 = shalt.err (!%p190_p10)
}
  0x1a   :  { %s194_s8 = scalar_lea.vmem %s30_s27, 128  ;;  %p199_p12 = scmp.lt.s32.totalorder %s30_s27, %s30_s27 }
  0x1b   :  { %p195_p11 = scmp.ne.s32.totalorder %s30_s27, %s194_s8  ;;  %p200_p13 = scmp.lt.s32.totalorder %s194_s8, %s194_s8 }
  0x1d   :  { %p201_p0 = por %p200_p13, %p199_p12 }
  0x1f   :  { %p202_p1 = pnand %p201_p0, %p195_p11 }
  0x21   :  { %205 = shalt.err (!%p202_p1)
}
  0x22   :  { %32 = dma.hbm_to_vmem [thread:$0]  %s300_s1, 128, %s30_s27, [#allocation6]  }
  0x23   :  { %228 = dma.done.wait [#allocation3], 256  }
  0x24   :  { %229 = vsyncadd [#allocation3], 4294967040 }
  0x25   :  { %230 = dma.done.wait [#allocation6], 128  }
  0x26   :  { %231 = vsyncadd [#allocation6], 4294967168  ;;  %v44_v0 = vlaneseq  ;;  %v41_v8 = vld [vmem:[#allocation5] sm:$0xff]  ;;  %v42_v9 = vld [vmem:[#allocation2] sm:$0x1]  ;;  %vm132_vm0 = vcmask 1041409  }
  0x27   :  { %v43_v10 = vld [vmem:[#allocation2 + $0x8] sm:$0x1]  ;;  %v50_v13 = vld [vmem:[#allocation2 + $0x1] sm:$0x1]  ;;  %v51_v14 = vld [vmem:[#allocation2 + $0x9] sm:$0x1] }
  0x28   :  { %v45_v1 = vshrl.u32 %v44_v0, 7  ;;  %v60_v16 = vld [vmem:[#allocation2 + $0x2] sm:$0x1]  ;;  %v61_v19 = vld [vmem:[#allocation2 + $0xa] sm:$0x1]  ;;  %s238_s11 = smov 119  }
  0x29   :  { %v70_v20 = vld [vmem:[#allocation2 + $0x3] sm:$0x1]  ;;  %v71_v21 = vld [vmem:[#allocation2 + $0xb] sm:$0x1]  ;;  %v80_v29 = vld [vmem:[#allocation2 + $0x4] sm:$0x1] }
  0x2a   :  { %v46_v2 = vsub.s32 0, %v45_v1  ;;  %v54_v3 = vsub.s32 1, %v45_v1  ;;  %v64_v4 = vsub.s32 2, %v45_v1  ;;  %v74_v5 = vsub.s32 3, %v45_v1  ;;  %v81_v30 = vld [vmem:[#allocation2 + $0xc] sm:$0x1] }
  0x2b   :  { %v84_v6 = vsub.s32 4, %v45_v1  ;;  %v94_v7 = vsub.s32 5, %v45_v1  ;;  %v104_v11 = vsub.s32 6, %v45_v1  ;;  %v114_v32 = vsub.s32 7, %v45_v1  ;;  %v90_v37 = vld [vmem:[#allocation2 + $0x5] sm:$0x1] }
  0x2c   :  { %v47_v12 = vrot.slane %v41_v8, %v46_v2  ;;  %v55_v15 = vrot.slane %v41_v8, %v54_v3  ;;  %v65_v17 = vrot.slane %v41_v8, %v64_v4  ;;  %v75_v18 = vrot.slane %v41_v8, %v74_v5  ;;  %v91_v38 = vld [vmem:[#allocation2 + $0xd] sm:$0x1]  ;;  %v100_v44 = vld [vmem:[#allocation2 + $0x6] sm:$0x1]  ;;  %v101_v45 = vld [vmem:[#allocation2 + $0xe] sm:$0x1] }
  0x2d   :  { %v85_v22 = vrot.slane %v41_v8, %v84_v6  ;;  %v95_v31 = vrot.slane %v41_v8, %v94_v7  ;;  %v105_v39 = vrot.slane %v41_v8, %v104_v11  ;;  %v115_v46 = vrot.slane %v41_v8, %v114_v32  ;;  %v110_v51 = vld [vmem:[#allocation2 + $0x7] sm:$0x1]  ;;  %v111_v52 = vld [vmem:[#allocation2 + $0xf] sm:$0x1]  ;;  %v155_v63 = vld [vmem:[%s301_s2] ss:$0 sm:$0xff] }
  0x2e   :  { %v48_v23 = vmul.f32 %v47_v12, %v42_v9  ;;  %v49_v24 = vmul.f32 %v47_v12, %v43_v10  ;;  %v56_v25 = vmul.f32 %v55_v15, %v50_v13  ;;  %v57_v26 = vmul.f32 %v55_v15, %v51_v14  ;;  %s239_s12 = smov [#allocation7]  }
  0x2f   :  { %v66_v27 = vmul.f32 %v65_v17, %v60_v16  ;;  %v67_v28 = vmul.f32 %v65_v17, %v61_v19  ;;  %v76_v35 = vmul.f32 %v75_v18, %v70_v20  ;;  %v77_v36 = vmul.f32 %v75_v18, %v71_v21  ;;  %s145_s13 = sshll.u32 %s239_s12, 4  ;;  %s146_s13 = int_to_ptr.vmem [resolvable:$true] %s145_s13 }
  0x30   :  { %v58_v33 = vadd.f32 %v56_v25, %v48_v23  ;;  %v59_v34 = vadd.f32 %v57_v26, %v49_v24  ;;  %v86_v42 = vmul.f32 %v85_v22, %v80_v29  ;;  %v87_v43 = vmul.f32 %v85_v22, %v81_v30  ;;  %s206_s14 = scalar_lea.vmem %s146_s13, 32  ;;  %p211_p3 = scmp.lt.s32.totalorder %s146_s13, %s146_s13 }
  0x31   :  { %v96_v49 = vmul.f32 %v95_v31, %v90_v37  ;;  %v97_v50 = vmul.f32 %v95_v31, %v91_v38  ;;  %v106_v55 = vmul.f32 %v105_v39, %v100_v44  ;;  %v107_v56 = vmul.f32 %v105_v39, %v101_v45  ;;  %p207_p2 = scmp.ne.s32.totalorder %s146_s13, %s206_s14  ;;  %p212_p4 = scmp.lt.s32.totalorder %s206_s14, %s206_s14 }
  0x32   :  { %v68_v40 = vadd.f32 %v66_v27, %v58_v33  ;;  %v69_v41 = vadd.f32 %v67_v28, %v59_v34  ;;  %v116_v59 = vmul.f32 %v115_v46, %v110_v51  ;;  %v117_v60 = vmul.f32 %v115_v46, %v111_v52 }
  0x33   :  { %vm137_vm1 = vcmask 50176   ;;  %p213_p5 = por %p212_p4, %p211_p3 }
  0x34   :  { %v78_v47 = vadd.f32 %v76_v35, %v68_v40  ;;  %v79_v48 = vadd.f32 %v77_v36, %v69_v41 }
  0x35   :  { %p214_p6 = pnand %p213_p5, %p207_p2 }
  0x36   :  { %v88_v53 = vadd.f32 %v86_v42, %v78_v47  ;;  %v89_v54 = vadd.f32 %v87_v43, %v79_v48 }
  0x38   :  { %v98_v57 = vadd.f32 %v96_v49, %v88_v53  ;;  %v99_v58 = vadd.f32 %v97_v50, %v89_v54 }
  0x3a   :  { %v108_v61 = vadd.f32 %v106_v55, %v98_v57  ;;  %v109_v62 = vadd.f32 %v107_v56, %v99_v58 }
  0x3c   :  { %v118_v0 = vadd.f32 %v116_v59, %v108_v61  ;;  %v119_v1 = vadd.f32 %v117_v60, %v109_v62 }
  0x3e   :  { %v127_v2 = vadd.f32 %v155_v63, %v118_v0  ;;  %v128_v3 = vadd.f32 %v155_v63, %v119_v1 }
  0x40   :  { %v131_v4 = vrot.slane %v128_v3, 7 }
  0x42   :  { %v133_v5 = vsel %vm132_vm0, %v131_v4, %v127_v2 }
  0x43   :  { %134 = vrot.lane.b32.xlu0 %v133_v5, %s238_s11 }
  0xb5   :  { %v135_v6 = vpop.permute.xlu0 %134 }
  0xb6   :  { %138 = vst.msk [vmem:[#allocation7] sm:$0x3] %vm137_vm1, %v135_v6 }
  0xb7   :  { %217 = shalt.err (!%p214_p6)
}
  0xb8   :  { %s218_s16 = scalar_lea.hbm %s302_s3, 32 }
  0xb9   :  { %p219_p7 = scmp.ne.s32.totalorder %s302_s3, %s218_s16  ;;  %p222_p8 = scmp.lt.u32.totalorder %s218_s16, %s302_s3 }
  0xbb   :  { %p224_p9 = pnand %p222_p8, %p219_p7 }
  0xbd   :  { %227 = shalt.err (!%p224_p9)
}
  0xbe   :  { %148 = dma.vmem_to_hbm [thread:$0]  %s146_s13, 32, %s302_s3, [#allocation4]  }
  0xbf   :  { %232 = dma.done.wait [#allocation4], 32  }
  0xc0   :  { %233 = vsyncadd [#allocation4], 4294967264 }
  0xc1   :  { %152 = vsyncpa [#allocation3], 1 }
  0xc2   :  { %153 = vsyncpa [#allocation6], 1 }
  0xc3   :  { %154 = vsyncpa [#allocation4], 1 }

</bundles_post_ra>
